<compile_context>
chip_gen: v5e
topology: v5e:2x2
jax: 0.10.0
libtpu: 0.0.40
codegen_flags: <defaults>
</compile_context>

<pallas_src>
import functools

import jax
import jax.numpy as jnp
import numpy as np
from jax.experimental import pallas as pl
from jax.experimental.pallas import tpu as pltpu

BN_EPS = 1e-5


def _round_up(x, m):
    return ((x + m - 1) // m) * m


# ----------------------------------------------------------------------------
# Kernels
# ----------------------------------------------------------------------------
def upsample_single_pass_kernel(wT_ref, colsT_ref, gamma_ref, beta_ref,
                                pool_ref, o_ref, *, inv_count):
    """Everything resident in VMEM; one grid step.

    wT_ref     [Ce, Kp]    Ce = s*s*Cout phase-batched output channels
    colsT_ref  [Kp, Mp]    sub-pixel im2col (M on the lane axis; zero-padded)
    gamma/beta [Ce, 1]
    pool_ref   [Ce, Ce]    0/1 matrix pooling the s*s phase rows per channel
    o_ref      [Ce, Mp]
    """
    conv = jnp.dot(wT_ref[...], colsT_ref[...],
                   preferred_element_type=jnp.float32)             # [Ce, Mp]
    # Padded columns are exactly zero, so they contribute nothing to the sums.
    row_sum = jnp.sum(conv, axis=1, keepdims=True)                 # [Ce, 1]
    row_ssq = jnp.sum(conv * conv, axis=1, keepdims=True)          # [Ce, 1]
    # Pool the s*s phase rows of each true channel (tiny [Ce,Ce]x[Ce,1] dots).
    sum_c = jnp.dot(pool_ref[...], row_sum, preferred_element_type=jnp.float32)
    ssq_c = jnp.dot(pool_ref[...], row_ssq, preferred_element_type=jnp.float32)
    mean = sum_c * inv_count
    # NOTE: E[x^2]-mean^2 in f32; fine at these sizes, consider shifted moments
    # for production-scale activation counts.
    var = ssq_c * inv_count - mean * mean
    scale = jax.lax.rsqrt(var + BN_EPS) * gamma_ref[...]
    y = (conv - mean) * scale + beta_ref[...]
    o_ref[...] = jnp.maximum(y, 0.0)


def upsample_tiled_kernel(wT_ref, colsT_ref, gamma_ref, beta_ref, pool_ref,
                          o_ref, sum_ref, ssq_ref, mean_ref, scale_ref, *,
                          inv_count):
    """Grid = (pass, tile).  Pass 0: accumulate raw per-row stats.
    Pass 1: finalize stats once (tile 0), then BN + ReLU + store per tile."""
    pass_id = pl.program_id(0)
    tile_id = pl.program_id(1)

    # ConvTranspose2d tile as one MXU matmul (transposed -> lane-dense output).
    conv = jnp.dot(wT_ref[...], colsT_ref[...],
                   preferred_element_type=jnp.float32)             # [Ce, TM]

    @pl.when((pass_id == 0) & (tile_id == 0))
    def _init():
        sum_ref[...] = jnp.zeros_like(sum_ref)
        ssq_ref[...] = jnp.zeros_like(ssq_ref)

    @pl.when(pass_id == 0)
    def _stats():
        # Raw per-row lane reductions only; phase-pooling deferred to pass 1
        # (pooling is linear, result is bit-identical math).
        sum_ref[...] += jnp.sum(conv, axis=1, keepdims=True)
        ssq_ref[...] += jnp.sum(conv * conv, axis=1, keepdims=True)

    @pl.when((pass_id == 1) & (tile_id == 0))
    def _finalize_stats():
        sum_c = jnp.dot(pool_ref[...], sum_ref[...],
                        preferred_element_type=jnp.float32)
        ssq_c = jnp.dot(pool_ref[...], ssq_ref[...],
                        preferred_element_type=jnp.float32)
        mean = sum_c * inv_count
        var = ssq_c * inv_count - mean * mean
        mean_ref[...] = mean
        scale_ref[...] = jax.lax.rsqrt(var + BN_EPS) * gamma_ref[...]

    @pl.when(pass_id == 1)
    def _normalize():
        y = (conv - mean_ref[...]) * scale_ref[...] + beta_ref[...]
        o_ref[...] = jnp.maximum(y, 0.0)


# ----------------------------------------------------------------------------
# Wrapper
# ----------------------------------------------------------------------------
def upsample_block(x_nchw, weight, bias, gamma, beta, *,
                   kernel_size, padding, stride, tile_m=512,
                   single_pass_vmem_budget=8 * 1024 * 1024,
                   force_tiled=False):
    """Forward pass of UpsampleBlock.  x_nchw: [N, Cin, H, W] float32.

    `bias` is accepted for interface parity but unused: training-mode
    BatchNorm's batch-mean subtraction cancels a per-channel constant exactly.
    """
    del bias
    N, Cin, H, W = x_nchw.shape
    Cin_w, Cout, kH, kW = weight.shape
    assert Cin_w == Cin and kH == kernel_size and kW == kernel_size
    s, p = stride, padding
    H_out = (H - 1) * s - 2 * p + kH
    W_out = (W - 1) * s - 2 * p + kW

    # Sub-pixel decomposition constraints (hold for this module's config).
    # TODO(synk): configs with kH % s != 0 need the dilated-im2col fallback.
    assert kH % s == 0 and kW % s == 0 and H_out % s == 0 and W_out % s == 0
    A_h, A_w = kH // s, kW // s            # taps per phase
    Hp, Wp = H_out // s, W_out // s        # per-phase output grid

    c_min, c_max = p // s, (s - 1 + p) // s
    U_h = c_max - c_min + A_h              # union of taps over all phases
    U_w = c_max - c_min + A_w
    pt_h = A_h - 1 - c_min
    pt_w = A_w - 1 - c_min
    pb_h = Hp + c_max - H
    pb_w = Wp + c_max - W
    assert min(pt_h, pt_w, pb_h, pb_w) >= 0

    Ce = s * s * Cout                      # phase-batched output channels
    U = U_h * U_w
    K = U * Cin
    K_pad = _round_up(K, 8)
    M = N * Hp * Wp

    # ---- glue (plain XLA): NCHW -> NHWC, pad, sub-pixel im2col [K, M] ----
    x = jnp.transpose(x_nchw, (0, 2, 3, 1)).astype(jnp.float32)
    xp = jnp.pad(x, ((0, 0), (pt_h, pb_h), (pt_w, pb_w), (0, 0)))
    patches = [xp[:, uh:uh + Hp, uw:uw + Wp, :]
               for uh in range(U_h) for uw in range(U_w)]          # [N,Hp,Wp,Cin]
    cols = jnp.stack(patches, axis=0)                              # [U,N,Hp,Wp,Cin]
    colsT = jnp.transpose(cols, (0, 4, 1, 2, 3)).reshape(K, M)

    # ---- phase-batched weight matrix via one numpy-precomputed gather ----
    # wT[phase*Cout + co, u*Cin + ci] = weight[ci, co, kh_idx, kw_idx] (or 0).
    kh_np = np.zeros((s * s, U), np.int32)
    kw_np = np.zeros((s * s, U), np.int32)
    valid_np = np.zeros((s * s, U), np.float32)
    for rh in range(s):
        m_h, c_h = (rh + p) % s, (rh + p) // s
        for rw in range(s):
            m_w, c_w = (rw + p) % s, (rw + p) // s
            phase = rh * s + rw
            for uh in range(U_h):
                a_h = c_h - (uh - pt_h)
                if not 0 <= a_h < A_h:
                    continue
                for uw in range(U_w):
                    a_w = c_w - (uw - pt_w)
                    if not 0 <= a_w < A_w:
                        continue
                    u = uh * U_w + uw
                    kh_np[phase, u] = m_h + a_h * s
                    kw_np[phase, u] = m_w + a_w * s
                    valid_np[phase, u] = 1.0
    w_hw = jnp.transpose(weight.astype(jnp.float32), (2, 3, 1, 0))  # [kH,kW,Co,Ci]
    taps = w_hw[kh_np, kw_np] * valid_np[:, :, None, None]          # [s*s,U,Co,Ci]
    wT = jnp.pad(jnp.transpose(taps, (0, 2, 1, 3)).reshape(Ce, K),
                 ((0, 0), (0, K_pad - K)))                          # [Ce, K_pad]

    gamma_eff = jnp.tile(gamma.astype(jnp.float32), s * s).reshape(Ce, 1)
    beta_eff = jnp.tile(beta.astype(jnp.float32), s * s).reshape(Ce, 1)
    ch_id = jnp.tile(jnp.arange(Cout, dtype=jnp.int32), s * s)
    pool = (ch_id[:, None] == ch_id[None, :]).astype(jnp.float32)   # [Ce, Ce]

    inv_count = 1.0 / float(N * H_out * W_out)

    # ---- pick execution path ----
    M_pad_1p = _round_up(M, 128)           # lane-dense single-pass slab
    resident_bytes = 4 * (K_pad * M_pad_1p + Ce * M_pad_1p
                          + Ce * K_pad + Ce * Ce + 4 * Ce)
    use_single_pass = (not force_tiled) and resident_bytes <= single_pass_vmem_budget

    if use_single_pass:
        M_pad = M_pad_1p
        colsT_pad = jnp.pad(colsT, ((0, K_pad - K), (0, M_pad - M)))
        vmem_limit = int(min(max(2 * resident_bytes + (4 << 20), 16 << 20),
                             48 << 20))
        outT = pl.pallas_call(
            functools.partial(upsample_single_pass_kernel, inv_count=inv_count),
            out_shape=jax.ShapeDtypeStruct((Ce, M_pad), jnp.float32),
            grid=(1,),
            in_specs=[
                pl.BlockSpec((Ce, K_pad), lambda i: (0, 0)),
                pl.BlockSpec((K_pad, M_pad), lambda i: (0, 0)),
                pl.BlockSpec((Ce, 1), lambda i: (0, 0)),
                pl.BlockSpec((Ce, 1), lambda i: (0, 0)),
                pl.BlockSpec((Ce, Ce), lambda i: (0, 0)),
            ],
            out_specs=pl.BlockSpec((Ce, M_pad), lambda i: (0, 0)),
            compiler_params=pltpu.CompilerParams(
                dimension_semantics=("arbitrary",),
                vmem_limit_bytes=vmem_limit),
        )(wT, colsT_pad, gamma_eff, beta_eff, pool)
    else:
        TM = max(128, (tile_m // 128) * 128)       # lane-dense tile width
        M_pad = _round_up(M, TM)
        n_tiles = M_pad // TM
        colsT_pad = jnp.pad(colsT, ((0, K_pad - K), (0, M_pad - M)))
        # Per-step VMEM footprint (double-buffered inputs + output + scratch).
        per_step_bytes = 4 * (2 * K_pad * TM + 2 * Ce * TM
                              + Ce * K_pad + Ce * Ce + 8 * Ce)
        vmem_limit = int(min(max(2 * per_step_bytes + (4 << 20), 16 << 20),
                             48 << 20))
        outT = pl.pallas_call(
            functools.partial(upsample_tiled_kernel, inv_count=inv_count),
            out_shape=jax.ShapeDtypeStruct((Ce, M_pad), jnp.float32),
            grid=(2, n_tiles),
            in_specs=[
                pl.BlockSpec((Ce, K_pad), lambda g, t: (0, 0)),
                pl.BlockSpec((K_pad, TM), lambda g, t: (0, t)),
                pl.BlockSpec((Ce, 1), lambda g, t: (0, 0)),
                pl.BlockSpec((Ce, 1), lambda g, t: (0, 0)),
                pl.BlockSpec((Ce, Ce), lambda g, t: (0, 0)),
            ],
            # Pass 0 holds the output index at block 0 (never written there),
            # so only pass-1 results are DMA'd back to HBM.
            out_specs=pl.BlockSpec((Ce, TM), lambda g, t: (0, g * t)),
            scratch_shapes=[pltpu.VMEM((Ce, 1), jnp.float32),   # sum
                            pltpu.VMEM((Ce, 1), jnp.float32),   # sum of squares
                            pltpu.VMEM((Ce, 1), jnp.float32),   # mean
                            pltpu.VMEM((Ce, 1), jnp.float32)],  # scale
            compiler_params=pltpu.CompilerParams(
                # Both axes "arbitrary": the VMEM stats accumulators are shared
                # across the whole grid (no megacore sharding of the tile axis).
                dimension_semantics=("arbitrary", "arbitrary"),
                vmem_limit_bytes=vmem_limit),
        )(wT, colsT_pad, gamma_eff, beta_eff, pool)

    # ---- glue: un-batch the s*s phases back to NCHW ----
    out = outT[:, :M].reshape(s, s, Cout, N, Hp, Wp)
    out = jnp.transpose(out, (3, 2, 4, 0, 5, 1))                   # [N,Co,Hp,s,Wp,s]
    return out.reshape(N, Cout, H_out, W_out)


# ----------------------------------------------------------------------------
# Pure-JAX reference (independent path via lax.conv_general_dilated)
# ----------------------------------------------------------------------------
def reference_forward(x_nchw, weight, bias, gamma, beta, *, kernel_size, padding, stride):
    Cin, Cout, kH, kW = weight.shape
    s, p = stride, padding
    x = jnp.transpose(x_nchw, (0, 2, 3, 1))                        # NHWC
    rhs = jnp.transpose(weight[:, :, ::-1, ::-1], (2, 3, 0, 1))    # HWIO
    y = jax.lax.conv_general_dilated(
        x, rhs,
        window_strides=(1, 1),
        padding=[(kH - 1 - p, kH - 1 - p), (kW - 1 - p, kW - 1 - p)],
        lhs_dilation=(s, s),
        dimension_numbers=("NHWC", "HWIO", "NHWC"),
        precision=jax.lax.Precision.HIGHEST,
    ) + bias
    mean = y.mean(axis=(0, 1, 2))
    var = ((y - mean) ** 2).mean(axis=(0, 1, 2))
    y = (y - mean) * jax.lax.rsqrt(var + BN_EPS) * gamma + beta
    y = jnp.maximum(y, 0.0)
    return jnp.transpose(y, (0, 3, 1, 2))


if __name__ == "__main__":
    # UpsampleBlock(in_channels=4, out_channels=8, kernel_size=4, padding=1, stride=2)
    N, Cin, H, W = 2, 4, 16, 16
    Cout, KS, PAD, STR = 8, 4, 1, 2

    key = jax.random.PRNGKey(0)
    kw_, kb_, kg_, kbe_, kx_ = jax.random.split(key, 5)
    weight = jax.random.uniform(kw_, (Cin, Cout, KS, KS), jnp.float32, -0.1, 0.1)
    bias = jax.random.uniform(kb_, (Cout,), jnp.float32, -0.1, 0.1)
    gamma = jax.random.uniform(kg_, (Cout,), jnp.float32, 0.5, 1.5)   # BN weight
    beta = jax.random.uniform(kbe_, (Cout,), jnp.float32, -0.5, 0.5)  # BN bias
    x = jax.random.normal(kx_, (N, Cin, H, W), jnp.float32)

    ref = jax.block_until_ready(
        reference_forward(x, weight, bias, gamma, beta,
                          kernel_size=KS, padding=PAD, stride=STR))

    # Default path: single-pass, fully VMEM-resident (fires for this shape).
    fwd_fast = jax.jit(functools.partial(upsample_block,
                                         kernel_size=KS, padding=PAD, stride=STR))
    out_fast = jax.block_until_ready(fwd_fast(x, weight, bias, gamma, beta))
    assert out_fast.shape == (N, Cout, 32, 32), out_fast.shape
    np.testing.assert_allclose(np.asarray(out_fast), np.asarray(ref),
                               rtol=1e-4, atol=1e-4)

    # Also exercise the tiled 2-pass path (forced, tile_m=256 -> 2 M-tiles).
    fwd_tiled = jax.jit(functools.partial(upsample_block,
                                          kernel_size=KS, padding=PAD, stride=STR,
                                          tile_m=256, force_tiled=True))
    out_tiled = jax.block_until_ready(fwd_tiled(x, weight, bias, gamma, beta))
    np.testing.assert_allclose(np.asarray(out_tiled), np.asarray(ref),
                               rtol=1e-4, atol=1e-4)

    print("KERNEL_OK")
</pallas_src>

<mosaic_0001>
module attributes {stable_mosaic.version = 11 : i64} {
  func.func @upsample_single_pass_kernel(%arg0: i32, %arg1: memref<32x40xf32, #tpu.memory_space<vmem>>, %arg2: memref<40x512xf32, #tpu.memory_space<vmem>>, %arg3: memref<32x1xf32, #tpu.memory_space<vmem>>, %arg4: memref<32x1xf32, #tpu.memory_space<vmem>>, %arg5: memref<32x32xf32, #tpu.memory_space<vmem>>, %arg6: memref<32x512xf32, #tpu.memory_space<vmem>>) attributes {dimension_semantics = [#tpu.dimension_semantics<arbitrary>], iteration_bounds = array<i64: 1>, scalar_prefetch = 0 : i64, scratch_operands = 0 : i64, tpu.core_type = #tpu.core_type<tc>, window_params = [{pipeline_mode = #tpu.pipeline_mode<synchronous>, transform_indices = @transform_0, window_bounds = array<i64: 32, 40>}, {pipeline_mode = #tpu.pipeline_mode<synchronous>, transform_indices = @transform_1, window_bounds = array<i64: 40, 512>}, {pipeline_mode = #tpu.pipeline_mode<synchronous>, transform_indices = @transform_2, window_bounds = array<i64: 32, 1>}, {pipeline_mode = #tpu.pipeline_mode<synchronous>, transform_indices = @transform_3, window_bounds = array<i64: 32, 1>}, {pipeline_mode = #tpu.pipeline_mode<synchronous>, transform_indices = @transform_4, window_bounds = array<i64: 32, 32>}, {pipeline_mode = #tpu.pipeline_mode<synchronous>, transform_indices = @transform_5, window_bounds = array<i64: 32, 512>}]} {
    %c0 = arith.constant 0 : index
    %c0_0 = arith.constant 0 : index
    %0 = vector.load %arg1[%c0, %c0_0] : memref<32x40xf32, #tpu.memory_space<vmem>>, vector<32x40xf32>
    %c0_1 = arith.constant 0 : index
    %c0_2 = arith.constant 0 : index
    %1 = vector.load %arg2[%c0_1, %c0_2] : memref<40x512xf32, #tpu.memory_space<vmem>>, vector<40x512xf32>
    %cst = arith.constant dense<0.000000e+00> : vector<32x512xf32>
    %2 = tpu.matmul %0, %1, %cst {dimension_numbers = #tpu.dot_dimension_numbers<[1], [0], [0], [1], [0, 0, 1, 1], [], []>} : vector<32x40xf32>, vector<40x512xf32>, vector<32x512xf32> -> vector<32x512xf32>
    %cst_3 = arith.constant dense<0.000000e+00> : vector<32xf32>
    %3 = vector.multi_reduction <add>, %2, %cst_3 [1] : vector<32x512xf32> to vector<32xf32>
    %4 = vector.shape_cast %3 : vector<32xf32> to vector<32x1xf32>
    %5 = arith.mulf %2, %2 : vector<32x512xf32>
    %cst_4 = arith.constant dense<0.000000e+00> : vector<32xf32>
    %6 = vector.multi_reduction <add>, %5, %cst_4 [1] : vector<32x512xf32> to vector<32xf32>
    %7 = vector.shape_cast %6 : vector<32xf32> to vector<32x1xf32>
    %c0_5 = arith.constant 0 : index
    %c0_6 = arith.constant 0 : index
    %8 = vector.load %arg5[%c0_5, %c0_6] : memref<32x32xf32, #tpu.memory_space<vmem>>, vector<32x32xf32>
    %cst_7 = arith.constant dense<0.000000e+00> : vector<32x1xf32>
    %9 = tpu.matmul %8, %4, %cst_7 {dimension_numbers = #tpu.dot_dimension_numbers<[1], [0], [0], [1], [0, 0, 1, 1], [], []>} : vector<32x32xf32>, vector<32x1xf32>, vector<32x1xf32> -> vector<32x1xf32>
    %c0_8 = arith.constant 0 : index
    %c0_9 = arith.constant 0 : index
    %10 = vector.load %arg5[%c0_8, %c0_9] : memref<32x32xf32, #tpu.memory_space<vmem>>, vector<32x32xf32>
    %cst_10 = arith.constant dense<0.000000e+00> : vector<32x1xf32>
    %11 = tpu.matmul %10, %7, %cst_10 {dimension_numbers = #tpu.dot_dimension_numbers<[1], [0], [0], [1], [0, 0, 1, 1], [], []>} : vector<32x32xf32>, vector<32x1xf32>, vector<32x1xf32> -> vector<32x1xf32>
    %cst_11 = arith.constant 4.8828125E-4 : f32
    %12 = vector.broadcast %cst_11 : f32 to vector<32x1xf32>
    %13 = arith.mulf %9, %12 : vector<32x1xf32>
    %cst_12 = arith.constant 4.8828125E-4 : f32
    %14 = vector.broadcast %cst_12 : f32 to vector<32x1xf32>
    %15 = arith.mulf %11, %14 : vector<32x1xf32>
    %16 = arith.mulf %13, %13 : vector<32x1xf32>
    %17 = arith.subf %15, %16 : vector<32x1xf32>
    %cst_13 = arith.constant 9.99999974E-6 : f32
    %18 = vector.broadcast %cst_13 : f32 to vector<32x1xf32>
    %19 = arith.addf %17, %18 : vector<32x1xf32>
    %20 = math.rsqrt %19 : vector<32x1xf32>
    %c0_14 = arith.constant 0 : index
    %c0_15 = arith.constant 0 : index
    %21 = vector.load %arg3[%c0_14, %c0_15] : memref<32x1xf32, #tpu.memory_space<vmem>>, vector<32x1xf32>
    %22 = arith.mulf %20, %21 : vector<32x1xf32>
    %23 = vector.broadcast %13 : vector<32x1xf32> to vector<32x512xf32>
    %24 = arith.subf %2, %23 : vector<32x512xf32>
    %25 = vector.broadcast %22 : vector<32x1xf32> to vector<32x512xf32>
    %26 = arith.mulf %24, %25 : vector<32x512xf32>
    %c0_16 = arith.constant 0 : index
    %c0_17 = arith.constant 0 : index
    %27 = vector.load %arg4[%c0_16, %c0_17] : memref<32x1xf32, #tpu.memory_space<vmem>>, vector<32x1xf32>
    %28 = vector.broadcast %27 : vector<32x1xf32> to vector<32x512xf32>
    %29 = arith.addf %26, %28 : vector<32x512xf32>
    %cst_18 = arith.constant 0.000000e+00 : f32
    %30 = vector.broadcast %cst_18 : f32 to vector<32x512xf32>
    %31 = arith.maximumf %29, %30 : vector<32x512xf32>
    %c0_19 = arith.constant 0 : index
    %c0_20 = arith.constant 0 : index
    %32 = vector.load %arg6[%c0_19, %c0_20] : memref<32x512xf32, #tpu.memory_space<vmem>>, vector<32x512xf32>
    tpu.vector_store %arg6[%c0_19, %c0_20], %31 {strides = array<i32>} : memref<32x512xf32, #tpu.memory_space<vmem>>, vector<32x512xf32>,
    return
  }
  func.func @transform_0(%arg0: i32) -> (i32, i32) {
    %c0_i32 = arith.constant 0 : i32
    %c0_i32_0 = arith.constant 0 : i32
    %c0_i32_1 = arith.constant 0 : i32
    return %c0_i32, %c0_i32_0 : i32, i32
  }
  func.func @transform_1(%arg0: i32) -> (i32, i32) {
    %c0_i32 = arith.constant 0 : i32
    %c0_i32_0 = arith.constant 0 : i32
    %c0_i32_1 = arith.constant 0 : i32
    return %c0_i32, %c0_i32_0 : i32, i32
  }
  func.func @transform_2(%arg0: i32) -> (i32, i32) {
    %c0_i32 = arith.constant 0 : i32
    %c0_i32_0 = arith.constant 0 : i32
    %c0_i32_1 = arith.constant 0 : i32
    return %c0_i32, %c0_i32_0 : i32, i32
  }
  func.func @transform_3(%arg0: i32) -> (i32, i32) {
    %c0_i32 = arith.constant 0 : i32
    %c0_i32_0 = arith.constant 0 : i32
    %c0_i32_1 = arith.constant 0 : i32
    return %c0_i32, %c0_i32_0 : i32, i32
  }
  func.func @transform_4(%arg0: i32) -> (i32, i32) {
    %c0_i32 = arith.constant 0 : i32
    %c0_i32_0 = arith.constant 0 : i32
    %c0_i32_1 = arith.constant 0 : i32
    return %c0_i32, %c0_i32_0 : i32, i32
  }
  func.func @transform_5(%arg0: i32) -> (i32, i32) {
    %c0_i32 = arith.constant 0 : i32
    %c0_i32_0 = arith.constant 0 : i32
    %c0_i32_1 = arith.constant 0 : i32
    return %c0_i32, %c0_i32_0 : i32, i32
  }
}

</mosaic_0001>

<bundles_post_ra>
// kernel: tile.19
= control target key start
LH: loop header
LB: loop body
LE: loop exit
PB: predicated region body
PF: predicated region fallthrough
CT: control target
= control target key end

     0   :  { %s22_s0 = inlined_call_operand.vmem [shape: f32[8], index: 0, kind: input, shape index: {}]   ;;  %s23_s1 = inlined_call_operand.vmem [shape: f32[4,8], index: 1, kind: output, shape index: {}]  }
   0x1   :  { %v4_v0 = vld [vmem:[%s22_s0] ss:$0 sm:$0xff] }
   0x2   :  { %5 = vst [vmem:[%s23_s1] sm:$0xf] %v4_v0 }

// kernel: tile.1
= control target key start
LH: loop header
LB: loop body
LE: loop exit
PB: predicated region body
PF: predicated region fallthrough
CT: control target
= control target key end

     0   :  { %s66_s8 = smov 125   ;;  %s67_s9 = smov 123   ;;  %vm7_vm0 = vcmask 7168   ;;  %s117_s0 = inlined_call_operand.vmem [shape: f32[4,8], index: 0, kind: input, shape index: {}]   ;;  %s118_s1 = inlined_call_operand.vmem [shape: f32[32,1], index: 1, kind: output, shape index: {}]  }
   0x1   :  { %v4_v0 = vld [vmem:[%s117_s0] sm:$0xf]  ;;  %s65_s0 = smov 127   ;;  %s68_s10 = smov 126  }
   0x2   :  { %5 = vst [vmem:[#allocation0] sm:$0xf] %v4_v0  ;;  %s69_s11 = smov 124   ;;  %s70_s12 = smov 122  }
   0x3   :  { %s71_s13 = smov 121  }
   0x9   :  { %v9_v1 = vld [vmem:[#allocation0] sm:$0xf]  }
   0xa   :  { %v21_v2 = vld [vmem:[#allocation0] sm:$0xf]   ;;  %10 = vrot.lane.b32.xlu0 %v9_v1, %s65_s0 }
   0xb   :  { %22 = vrot.lane.b32.xlu1 %v21_v2, %s66_s8  ;;  %v33_v3 = vld [vmem:[#allocation0] sm:$0xf]  }
   0xc   :  { %34 = vrot.lane.b32.xlu2 %v33_v3, %s67_s9  ;;  %v15_v4 = vld [vmem:[#allocation0] sm:$0xf]  }
   0xd   :  { %v27_v5 = vld [vmem:[#allocation0] sm:$0xf]  }
   0xe   :  { %v39_v6 = vld [vmem:[#allocation0] sm:$0xf]  }
   0xf   :  { %v45_v7 = vld [vmem:[#allocation0] sm:$0xf]  }
  0x10   :  { %v6_v8 = vld [vmem:[#allocation0] sm:$0xf]  }
  0x11   :  { %8 = vst.msk [vmem:[%s118_s1] ss:$8 sm:$0xf] %vm7_vm0, %v6_v8  }
  0x12   :  { %16 = vrot.lane.b32.xlu0 %v15_v4, %s68_s10 }
  0x13   :  { %28 = vrot.lane.b32.xlu1 %v27_v5, %s69_s11 }
  0x14   :  { %40 = vrot.lane.b32.xlu2 %v39_v6, %s70_s12 }
  0x1a   :  { %46 = vrot.lane.b32.xlu0 %v45_v7, %s71_s13 }
  0x66   :  { %v35_v9 = vpop.permute.xlu2 %34  }
  0x67   :  { %55 = vst.msk [vmem:[%s118_s1 + $0x5] ss:$8 sm:$0xf] %vm7_vm0, %v35_v9  }
  0x6e   :  { %v41_v10 = vpop.permute.xlu2 %40  }
  0x6f   :  { %56 = vst.msk [vmem:[%s118_s1 + $0x6] ss:$8 sm:$0xf] %vm7_vm0, %v41_v10  }
  0x7c   :  { %v11_v11 = vpop.permute.xlu0 %10  }
  0x7d   :  { %v23_v12 = vpop.permute.xlu1 %22   ;;  %51 = vst.msk [vmem:[%s118_s1 + $0x1] ss:$8 sm:$0xf] %vm7_vm0, %v11_v11  }
  0x7e   :  { %53 = vst.msk [vmem:[%s118_s1 + $0x3] ss:$8 sm:$0xf] %vm7_vm0, %v23_v12  }
  0x84   :  { %v17_v13 = vpop.permute.xlu0 %16  }
  0x85   :  { %v29_v14 = vpop.permute.xlu1 %28   ;;  %52 = vst.msk [vmem:[%s118_s1 + $0x2] ss:$8 sm:$0xf] %vm7_vm0, %v17_v13  }
  0x86   :  { %54 = vst.msk [vmem:[%s118_s1 + $0x4] ss:$8 sm:$0xf] %vm7_vm0, %v29_v14  }
  0x8c   :  { %v47_v15 = vpop.permute.xlu0 %46  }
  0x8d   :  { %57 = vst.msk [vmem:[%s118_s1 + $0x7] ss:$8 sm:$0xf] %vm7_vm0, %v47_v15  }

// kernel: eq.8
= control target key start
LH: loop header
LB: loop body
LE: loop exit
PB: predicated region body
PF: predicated region fallthrough
CT: control target
= control target key end

     0   :  { %s37_s8 = smov 8   ;;  %s38_s9 = smov 16   ;;  %vm7_vm0 = vcmask 64512   ;;  %vm13_vm1 = vcmask 261312   ;;  %vm19_vm2 = vcmask 195712   ;;  %vm25_vm3 = vcmask 130112   ;;  %s55_s0 = inlined_call_operand.vmem [shape: s32[4,8], index: 0, kind: input, shape index: {}]   ;;  %s56_s1 = inlined_call_operand.vmem [shape: s32[32], index: 1, kind: output, shape index: {}]  }
   0x1   :  { %v4_v0 = vld [vmem:[%s55_s0] sm:$0xf]  ;;  %s36_s0 = smov 24  }
   0x2   :  { %5 = vst [vmem:[#allocation1] sm:$0xf] %v4_v0 }
   0x9   :  { %v10_v1 = vld [vmem:[#allocation1 + $0x3] sm:$0x1]   ;;  %v22_v2 = vld [vmem:[#allocation1 + $0x1] sm:$0x1]   ;;  %v16_v3 = vld [vmem:[#allocation1 + $0x2] sm:$0x1]  }
   0xa   :  { %11 = vrot.lane.b32.xlu0 %v10_v1, %s36_s0  ;;  %23 = vrot.lane.b32.xlu1 %v22_v2, %s37_s8  ;;  %v6_v4 = vld [vmem:[#allocation1] sm:$0x1]  }
   0xb   :  { %8 = vst.msk [vmem:[#allocation0] sm:$0x1] %vm7_vm0, %v6_v4  }
  0x12   :  { %17 = vrot.lane.b32.xlu0 %v16_v3, %s38_s9 }
  0x7c   :  { %v12_v5 = vpop.permute.xlu0 %11   ;;  %v24_v6 = vpop.permute.xlu1 %23  }
  0x7d   :  { %14 = vst.msk [vmem:[#allocation0] sm:$0x1] %vm13_vm1, %v12_v5  }
  0x84   :  { %v18_v7 = vpop.permute.xlu0 %17  }
  0x85   :  { %20 = vst.msk [vmem:[#allocation0] sm:$0x1] %vm19_vm2, %v18_v7  }
  0x86   :  { %26 = vst.msk [vmem:[#allocation0] sm:$0x1] %vm25_vm3, %v24_v6  }
  0x8d   :  { %v29_v8 = vld [vmem:[#allocation0] sm:$0x1] }
  0x8e   :  { %32 = vst [vmem:[%s56_s1] sm:$0x1] %v29_v8 }

// kernel: upsample_block.1
= control target key start
LH: loop header
LB: loop body
LE: loop exit
PB: predicated region body
PF: predicated region fallthrough
CT: control target
= control target key end

     0   :  { %vm44_vm0 = vcmask 326656   ;;  %vm233_vm1 = vcmask 261120   ;;  %s873_s1 = inlined_call_operand.vmem [shape: f32[40,512], index: 1, kind: input, shape index: {}]   ;;  %s874_s0 = inlined_call_operand.vmem [shape: f32[32,40], index: 0, kind: input, shape index: {}]   ;;  %s875_s4 = inlined_call_operand.vmem [shape: f32[32,32], index: 4, kind: input, shape index: {}]   ;;  %s876_s3 = inlined_call_operand.vmem [shape: f32[32,1], index: 3, kind: input, shape index: {}]   ;;  %s877_s2 = inlined_call_operand.vmem [shape: f32[32,1], index: 2, kind: input, shape index: {}]   ;;  %s878_s5 = inlined_call_operand.vmem [shape: f32[32,512], index: 5, kind: output, shape index: {}]  }
   0x1   :  { %v40_v0 = vld [vmem:[%s873_s1 + $0x80] sm:$0xff]  ;;  %v41_v1 = vld [vmem:[%s873_s1 + $0x88] sm:$0xff]  ;;  %v22_v10 = vld [vmem:[%s874_s0 + $0x10] sm:$0xff] }
   0x2   :  { %v36_v2 = vld [vmem:[%s873_s1 + $0x60] sm:$0xff]  ;;  %544 = vmatpush.msra.mxu2 %v40_v0  ;;  %549 = vmatpush.msra.mxu3 %v41_v1  ;;  %v37_v3 = vld [vmem:[%s873_s1 + $0x68] sm:$0xff]  ;;  %v42_v11 = vld [vmem:[%s873_s1 + $0x90] sm:$0xff] }
   0x3   :  { %v32_v4 = vld [vmem:[%s873_s1 + $0x40] sm:$0xff]  ;;  %v33_v5 = vld [vmem:[%s873_s1 + $0x48] sm:$0xff]  ;;  %68 = vmatpush.msra.mxu0 %v40_v0  ;;  %97 = vmatpush.msra.mxu1 %v41_v1  ;;  %v43_v12 = vld [vmem:[%s873_s1 + $0x98] sm:$0xff] }
   0x4   :  { %545 = vmatpush.msra.mxu2 %v36_v2  ;;  %550 = vmatpush.msra.mxu3 %v37_v3  ;;  %v28_v6 = vld [vmem:[%s873_s1 + $0x20] sm:$0xff]  ;;  %v29_v7 = vld [vmem:[%s873_s1 + $0x28] sm:$0xff]  ;;  %v38_v13 = vld [vmem:[%s873_s1 + $0x70] sm:$0xff] }
   0x5   :  { %69 = vmatpush.msra.mxu0 %v36_v2  ;;  %98 = vmatpush.msra.mxu1 %v37_v3  ;;  %v24_v8 = vld [vmem:[%s873_s1] sm:$0xff]  ;;  %v25_v9 = vld [vmem:[%s873_s1 + $0x8] sm:$0xff]  ;;  %v39_v14 = vld [vmem:[%s873_s1 + $0x78] sm:$0xff] }
   0x6   :  { %546 = vmatpush.msra.mxu2 %v32_v4  ;;  %551 = vmatpush.msra.mxu3 %v33_v5  ;;  %v34_v15 = vld [vmem:[%s873_s1 + $0x50] sm:$0xff]  ;;  %v35_v16 = vld [vmem:[%s873_s1 + $0x58] sm:$0xff]  ;;  %v20_v17 = vld [vmem:[%s874_s0] sm:$0xff] }
   0x7   :  { %70 = vmatpush.msra.mxu0 %v32_v4  ;;  %99 = vmatpush.msra.mxu1 %v33_v5  ;;  %v30_v18 = vld [vmem:[%s873_s1 + $0x30] sm:$0xff]  ;;  %v31_v19 = vld [vmem:[%s873_s1 + $0x38] sm:$0xff]  ;;  %v21_v23 = vld [vmem:[%s874_s0 + $0x8] sm:$0xff] }
   0x8   :  { %547 = vmatpush.msra.mxu2 %v28_v6  ;;  %552 = vmatpush.msra.mxu3 %v29_v7  ;;  %v23_v20 = vld [vmem:[%s874_s0 + $0x18] sm:$0xff]  ;;  %v26_v21 = vld [vmem:[%s873_s1 + $0x10] sm:$0xff] }
   0x9   :  { %71 = vmatpush.msra.mxu0 %v28_v6  ;;  %100 = vmatpush.msra.mxu1 %v29_v7  ;;  %v27_v22 = vld [vmem:[%s873_s1 + $0x18] sm:$0xff] }
   0xa   :  { %548 = vmatpush.msra.mxu2 %v24_v8  ;;  %553 = vmatpush.msra.mxu3 %v25_v9 }
   0xb   :  { %522 = vmatmul.msk.f32.vlgmr.msra.gmra.mxu2 %vm44_vm0, %v22_v10  ;;  %526 = vmatmul.msk.f32.vlgmr.msra.gmra.mxu3 %vm44_vm0, %v22_v10 }
   0xc   :  { %126 = vmatpush.msrb.mxu2 %v42_v11  ;;  %155 = vmatpush.msrb.mxu3 %v43_v12 }
   0xd   :  { %72 = vmatpush.msra.mxu0 %v24_v8  ;;  %101 = vmatpush.msra.mxu1 %v25_v9 }
   0xe   :  { %127 = vmatpush.msrb.mxu2 %v38_v13  ;;  %156 = vmatpush.msrb.mxu3 %v39_v14 }
   0xf   :  { %520 = vmatmul.msk.f32.vlgmr.msra.gmra.mxu0 %vm44_vm0, %v20_v17  ;;  %524 = vmatmul.msk.f32.vlgmr.msra.gmra.mxu1 %vm44_vm0, %v20_v17 }
  0x10   :  { %128 = vmatpush.msrb.mxu2 %v34_v15  ;;  %157 = vmatpush.msrb.mxu3 %v35_v16 }
  0x12   :  { %129 = vmatpush.msrb.mxu2 %v30_v18  ;;  %158 = vmatpush.msrb.mxu3 %v31_v19 }
  0x13   :  { %523 = vmatmul.msk.f32.gmra.mxu2 %vm44_vm0, %v23_v20  ;;  %527 = vmatmul.msk.f32.gmra.mxu3 %vm44_vm0, %v23_v20 }
  0x14   :  { %130 = vmatpush.msrb.mxu2 %v26_v21  ;;  %159 = vmatpush.msrb.mxu3 %v27_v22  ;;  %v229_v21 = vld [vmem:[%s875_s4] sm:$0xff] }
  0x17   :  { %521 = vmatmul.msk.f32.gmra.mxu0 %vm44_vm0, %v21_v23  ;;  %525 = vmatmul.msk.f32.gmra.mxu1 %vm44_vm0, %v21_v23 }
  0x1b   :  { %528 = vmatmul.msk.f32.vlgmr.msrb.gmra.mxu2 %vm44_vm0, %v20_v17  ;;  %532 = vmatmul.msk.f32.vlgmr.msrb.gmra.mxu3 %vm44_vm0, %v20_v17 }
  0x23   :  { %529 = vmatmul.msk.f32.gmra.mxu2 %vm44_vm0, %v21_v23  ;;  %533 = vmatmul.msk.f32.gmra.mxu3 %vm44_vm0, %v21_v23 }
  0x2b   :  { %530 = vmatmul.msk.f32.gmra.mxu2 %vm44_vm0, %v22_v10  ;;  %534 = vmatmul.msk.f32.gmra.mxu3 %vm44_vm0, %v22_v10 }
  0x33   :  { %531 = vmatmul.msk.f32.gmra.mxu2 %vm44_vm0, %v23_v20  ;;  %535 = vmatmul.msk.f32.gmra.mxu3 %vm44_vm0, %v23_v20 }
  0x8c   :  { %v689_v26 = vpop.f32.mrf.mxu0  ;;  %v691_v27 = vpop.f32.mrf.mxu1 }
  0x8d   :  { %v173_v52 = vadd.f32 %v691_v27, %v689_v26  ;;  %v193_v57 = vmul.f32 %v689_v26, %v689_v26  ;;  %v194_v58 = vmul.f32 %v691_v27, %v691_v27 }
  0x8e   :  { %v685_v24 = vpop.f32.mrf.mxu2  ;;  %v687_v25 = vpop.f32.mrf.mxu3 }
  0x8f   :  { %v201_v39 = vmul.f32 %v685_v24, %v685_v24  ;;  %v202_v40 = vmul.f32 %v687_v25, %v687_v25  ;;  %v183_v41 = vadd.f32 %v687_v25, %v685_v24  ;;  %v209_v9 = vadd.f32 %v194_v58, %v193_v57  ;;  %v447_v58 = vld [vmem:[%s876_s3 + $0x18] sm:$0xff] }
  0x91   :  { %v219_v47 = vadd.f32 %v202_v40, %v201_v39  ;;  %v232_v39 = vld [vmem:[%s875_s4 + $0x18] sm:$0xff]  ;;  %v566_v40 = vmov 0  }
  0x92   :  { %556 = vset.pattern.permute.xlu2 %v566_v40  ;;  %555 = vset.pattern.permute.xlu0 %v566_v40 }
  0x93   :  { %557 = vset.pattern.permute.xlu1 %v566_v40  ;;  %v365_v40 = vld [vmem:[%s877_s2 + $0x8] sm:$0xff] }
  0x94   :  { %v701_v32 = vpop.f32.mrf.mxu0  ;;  %v703_v33 = vpop.f32.mrf.mxu1 }
  0x95   :  { %v178_v34 = vadd.f32 %v703_v33, %v701_v32  ;;  %v197_v55 = vmul.f32 %v701_v32, %v701_v32  ;;  %v198_v56 = vmul.f32 %v703_v33, %v703_v33 }
  0x96   :  { %v693_v28 = vpop.f32.mrf.mxu2  ;;  %v695_v29 = vpop.f32.mrf.mxu3 }
  0x97   :  { %v205_v50 = vmul.f32 %v693_v28, %v693_v28  ;;  %v206_v51 = vmul.f32 %v695_v29, %v695_v29  ;;  %v188_v54 = vadd.f32 %v695_v29, %v693_v28  ;;  %v214_v5 = vadd.f32 %v198_v56, %v197_v55 }
  0x99   :  { %v224_v61 = vadd.f32 %v206_v51, %v205_v50 }
  0x9e   :  { %v697_v30 = vpop.f32.mrf.mxu2  ;;  %v699_v31 = vpop.f32.mrf.mxu3 }
  0x9f   :  { %v174_v1 = vadd.f32 %v173_v52, %v697_v30  ;;  %v195_v6 = vmul.f32 %v697_v30, %v697_v30  ;;  %v196_v12 = vmul.f32 %v699_v31, %v699_v31 }
  0xa1   :  { %v175_v7 = vadd.f32 %v174_v1, %v699_v31  ;;  %v210_v13 = vadd.f32 %v209_v9, %v195_v6 }
  0xa3   :  { %v211_v15 = vadd.f32 %v210_v13, %v196_v12 }
  0xa6   :  { %v707_v35 = vpop.f32.mrf.mxu2  ;;  %v709_v36 = vpop.f32.mrf.mxu3 }
  0xa7   :  { %v179_v37 = vadd.f32 %v178_v34, %v707_v35  ;;  %v199_v2 = vmul.f32 %v707_v35, %v707_v35  ;;  %v200_v10 = vmul.f32 %v709_v36, %v709_v36 }
  0xa9   :  { %v180_v38 = vadd.f32 %v179_v37, %v709_v36  ;;  %v215_v11 = vadd.f32 %v214_v5, %v199_v2  ;;  %v230_v37 = vld [vmem:[%s875_s4 + $0x8] sm:$0xff] }
  0xab   :  { %181 = vadd.xlane.f32.xlu1 %v180_v38  ;;  %v216_v14 = vadd.f32 %v215_v11, %v200_v10  ;;  %v231_v38 = vld [vmem:[%s875_s4 + $0x10] sm:$0xff] }
  0xae   :  { %v719_v42 = vpop.f32.mrf.mxu2  ;;  %v721_v43 = vpop.f32.mrf.mxu3 }
  0xaf   :  { %v203_v44 = vmul.f32 %v719_v42, %v719_v42  ;;  %v184_v45 = vadd.f32 %v183_v41, %v719_v42  ;;  %v204_v46 = vmul.f32 %v721_v43, %v721_v43  ;;  %v444_v41 = vld [vmem:[%s876_s3] sm:$0xff] }
  0xb1   :  { %v185_v48 = vadd.f32 %v184_v45, %v721_v43  ;;  %v220_v49 = vadd.f32 %v219_v47, %v203_v44 }
  0xb3   :  { %186 = vadd.xlane.f32.xlu0 %v185_v48  ;;  %v221_v53 = vadd.f32 %v220_v49, %v204_v46 }
  0xb5   :  { %222 = vadd.xlane.f32.xlu2 %v221_v53 }
  0xb6   :  { %v745_v59 = vpop.f32.mrf.mxu2  ;;  %v747_v60 = vpop.f32.mrf.mxu3 }
  0xb7   :  { %v189_v62 = vadd.f32 %v188_v54, %v745_v59  ;;  %v207_v63 = vmul.f32 %v745_v59, %v745_v59  ;;  %v208_v0 = vmul.f32 %v747_v60, %v747_v60 }
  0xb9   :  { %v190_v3 = vadd.f32 %v189_v62, %v747_v60  ;;  %v225_v4 = vadd.f32 %v224_v61, %v207_v63 }
  0xbb   :  { %191 = vadd.xlane.f32.xlu0 %v190_v3  ;;  %v226_v8 = vadd.f32 %v225_v4, %v208_v0 }
  0xbd   :  { %176 = vadd.xlane.f32.xlu2 %v175_v7  ;;  %227 = vadd.xlane.f32.xlu1 %v226_v8 }
  0xc3   :  { %217 = vadd.xlane.f32.xlu0 %v216_v14 }
  0xc5   :  { %212 = vadd.xlane.f32.xlu1 %v211_v15 }
  0xd7   :  { %450 = vperm.xlu0 %555, %v444_v41  }
 0x11e   :  { %v182_v17 = vpop.xlane.xlu1 %181 }
 0x126   :  { %v187_v16 = vpop.xlane.xlu0 %186 }
 0x128   :  { %v223_v18 = vpop.xlane.xlu2 %222 }
 0x12e   :  { %v192_v19 = vpop.xlane.xlu0 %191 }
 0x12f   :  { %258 = vmatpush.msrb.mxu0 %v192_v19 }
 0x130   :  { %v228_v20 = vpop.xlane.xlu1 %227  ;;  %v177_v22 = vpop.xlane.xlu2 %176 }
 0x131   :  { %259 = vmatpush.msrb.mxu0 %v187_v16  ;;  %287 = vmatpush.msrb.mxu1 %v228_v20  ;;  %v364_v20 = vld [vmem:[%s877_s2] sm:$0xff] }
 0x133   :  { %260 = vmatpush.msrb.mxu0 %v182_v17  ;;  %288 = vmatpush.msrb.mxu1 %v223_v18 }
 0x135   :  { %261 = vmatpush.msrb.mxu0 %v177_v22 }
 0x136   :  { %v218_v23 = vpop.xlane.xlu0 %217  ;;  %536 = vmatmul.msk.f32.vlgmr.msrb.gmra.mxu0 %vm233_vm1, %v229_v21 }
 0x137   :  { %289 = vmatpush.msrb.mxu1 %v218_v23 }
 0x138   :  { %v213_v34 = vpop.xlane.xlu1 %212 }
 0x139   :  { %290 = vmatpush.msrb.mxu1 %v213_v34 }
 0x13a   :  { %540 = vmatmul.msk.f32.vlgmr.msrb.gmra.mxu1 %vm233_vm1, %v229_v21 }
 0x13e   :  { %537 = vmatmul.msk.f32.gmra.mxu0 %vm233_vm1, %v230_v37 }
 0x142   :  { %541 = vmatmul.msk.f32.gmra.mxu1 %vm233_vm1, %v230_v37 }
 0x146   :  { %538 = vmatmul.msk.f32.gmra.mxu0 %vm233_vm1, %v231_v38 }
 0x14a   :  { %542 = vmatmul.msk.f32.gmra.mxu1 %vm233_vm1, %v231_v38 }
 0x14e   :  { %539 = vmatmul.msk.f32.gmra.mxu0 %vm233_vm1, %v232_v39 }
 0x152   :  { %543 = vmatmul.msk.f32.gmra.mxu1 %vm233_vm1, %v232_v39 }
 0x1b3   :  { %v263_v44 = vpop.f32.mrf.mxu0 }
 0x1b4   :  { %v304_v45 = vmul.f32 0.00048828125, %v263_v44 }
 0x1b6   :  { %v312_v46 = vmul.f32 %v304_v45, %v304_v45  ;;  %374 = vperm.xlu2 %556, %v304_v45  }
 0x1b7   :  { %v292_v47 = vpop.f32.mrf.mxu1 }
 0x1b8   :  { %v308_v48 = vmul.f32 0.00048828125, %v292_v47 }
 0x1ba   :  { %v316_v49 = vsub.f32 %v308_v48, %v312_v46 }
 0x1bb   :  { %v266_v50 = vpop.f32.mrf.mxu0 }
 0x1bc   :  { %v320_v51 = vadd.f32 1e-05, %v316_v49  ;;  %v305_v52 = vmul.f32 0.00048828125, %v266_v50 }
 0x1be   :  { %558 = vrsqrt.f32 %v320_v51  ;;  %v313_v53 = vmul.f32 %v305_v52, %v305_v52  ;;  %379 = vperm.xlu0 %555, %v305_v52   ;;  %vm330_vm3 = vweird.f32 %v320_v51 }
 0x1bf   :  { %v295_v54 = vpop.f32.mrf.mxu1 }
 0x1c0   :  { %v309_v55 = vmul.f32 0.00048828125, %v295_v54 }
 0x1c2   :  { %v317_v56 = vsub.f32 %v309_v55, %v313_v53 }
 0x1c3   :  { %v269_v57 = vpop.f32.mrf.mxu0 }
 0x1c4   :  { %v559_v61 = vpop.eup %558  ;;  %v321_v62 = vadd.f32 1e-05, %v317_v56  ;;  %v306_v63 = vmul.f32 0.00048828125, %v269_v57 }
 0x1c5   :  { %v325_v0 = vmul.f32 %v559_v61, %v320_v51  ;;  %vm331_vm2 = vweird.f32 %v559_v61  ;;  %v366_v51 = vld [vmem:[%s877_s2 + $0x10] sm:$0xff] }
 0x1c6   :  { %560 = vrsqrt.f32 %v321_v62  ;;  %v314_v1 = vmul.f32 %v306_v63, %v306_v63  ;;  %384 = vperm.xlu1 %557, %v306_v63   ;;  %465 = vperm.xlu0 %555, %v447_v58   ;;  %vm332_vm4 = vmor %vm330_vm3, %vm331_vm2  ;;  %vm340_vm6 = vweird.f32 %v321_v62  ;;  %v367_v58 = vld [vmem:[%s877_s2 + $0x18] sm:$0xff] }
 0x1c7   :  { %v326_v2 = vmul.f32 %v559_v61, %v325_v0  ;;  %v298_v3 = vpop.f32.mrf.mxu1  ;;  %v446_v0 = vld [vmem:[%s876_s3 + $0x10] sm:$0xff] }
 0x1c8   :  { %v310_v4 = vmul.f32 0.00048828125, %v298_v3 }
 0x1c9   :  { %v327_v5 = vmul.f32 0.5, %v326_v2 }
 0x1ca   :  { %v318_v6 = vsub.f32 %v310_v4, %v314_v1 }
 0x1cb   :  { %v328_v7 = vsub.f32 1.5, %v327_v5  ;;  %v272_v8 = vpop.f32.mrf.mxu0 }
 0x1cc   :  { %v561_v9 = vpop.eup %560  ;;  %v322_v10 = vadd.f32 1e-05, %v318_v6  ;;  %v307_v11 = vmul.f32 0.00048828125, %v272_v8 }
 0x1cd   :  { %v335_v12 = vmul.f32 %v561_v9, %v321_v62  ;;  %v329_v13 = vmul.f32 %v559_v61, %v328_v7  ;;  %vm341_vm5 = vweird.f32 %v561_v9  ;;  %v445_v62 = vld [vmem:[%s876_s3 + $0x8] sm:$0xff] }
 0x1ce   :  { %562 = vrsqrt.f32 %v322_v10  ;;  %v315_v14 = vmul.f32 %v307_v11, %v307_v11  ;;  %389 = vperm.xlu2 %556, %v307_v11   ;;  %vm342_vm7 = vmor %vm340_vm6, %vm341_vm5  ;;  %vm350_vm9 = vweird.f32 %v322_v10 }
 0x1cf   :  { %v336_v15 = vmul.f32 %v561_v9, %v335_v12  ;;  %v301_v16 = vpop.f32.mrf.mxu1  ;;  %v333_v19 = vsel %vm332_vm4, %v559_v61, %v329_v13  ;;  %v451_v12 = vpop.permute.xlu0 %450 }
 0x1d0   :  { %v311_v17 = vmul.f32 0.00048828125, %v301_v16  ;;  %v368_v37 = vmul.f32 %v364_v20, %v333_v19 }
 0x1d1   :  { %v337_v18 = vmul.f32 0.5, %v336_v15 }
 0x1d2   :  { %v319_v21 = vsub.f32 %v311_v17, %v315_v14 }
 0x1d3   :  { %v338_v22 = vsub.f32 1.5, %v337_v18 }
 0x1d4   :  { %v563_v23 = vpop.eup %562  ;;  %v323_v34 = vadd.f32 1e-05, %v319_v21 }
 0x1d5   :  { %v345_v38 = vmul.f32 %v563_v23, %v322_v10  ;;  %v339_v39 = vmul.f32 %v561_v9, %v338_v22  ;;  %vm351_vm8 = vweird.f32 %v563_v23 }
 0x1d6   :  { %564 = vrsqrt.f32 %v323_v34  ;;  %410 = vperm.xlu2 %556, %v368_v37   ;;  %vm352_vm10 = vmor %vm350_vm9, %vm351_vm8  ;;  %vm360_vm12 = vweird.f32 %v323_v34 }
 0x1d7   :  { %v346_v41 = vmul.f32 %v563_v23, %v345_v38  ;;  %v343_v44 = vsel %vm342_vm7, %v561_v9, %v339_v39 }
 0x1d8   :  { %v369_v45 = vmul.f32 %v365_v40, %v343_v44 }
 0x1d9   :  { %v347_v46 = vmul.f32 0.5, %v346_v41 }
 0x1da   :  { %415 = vperm.xlu1 %557, %v369_v45  }
 0x1db   :  { %v348_v47 = vsub.f32 1.5, %v347_v46 }
 0x1dc   :  { %v565_v48 = vpop.eup %564 }
 0x1dd   :  { %v355_v49 = vmul.f32 %v565_v48, %v323_v34  ;;  %v349_v50 = vmul.f32 %v563_v23, %v348_v47  ;;  %vm361_vm11 = vweird.f32 %v565_v48 }
 0x1de   :  { %vm362_vm13 = vmor %vm360_vm12, %vm361_vm11 }
 0x1df   :  { %v356_v52 = vmul.f32 %v565_v48, %v355_v49  ;;  %v353_v53 = vsel %vm352_vm10, %v563_v23, %v349_v50 }
 0x1e0   :  { %v370_v54 = vmul.f32 %v366_v51, %v353_v53 }
 0x1e1   :  { %v357_v55 = vmul.f32 0.5, %v356_v52 }
 0x1e2   :  { %420 = vperm.xlu2 %556, %v370_v54  }
 0x1e3   :  { %v358_v56 = vsub.f32 1.5, %v357_v55 }
 0x1e5   :  { %v359_v57 = vmul.f32 %v565_v48, %v358_v56 }
 0x1e7   :  { %v363_v61 = vsel %vm362_vm13, %v565_v48, %v359_v57 }
 0x1e8   :  { %v371_v63 = vmul.f32 %v367_v58, %v363_v61 }
 0x1ea   :  { %425 = vperm.xlu1 %557, %v371_v63   ;;  %455 = vperm.xlu2 %556, %v445_v62  }
 0x1f2   :  { %460 = vperm.xlu1 %557, %v446_v0  }
 0x210   :  { %v375_v1 = vpop.permute.xlu2 %374 }
 0x211   :  { %v392_v3 = vsub.f32 %v689_v26, %v375_v1  ;;  %v393_v4 = vsub.f32 %v691_v27, %v375_v1  ;;  %v394_v5 = vsub.f32 %v697_v30, %v375_v1  ;;  %v395_v6 = vsub.f32 %v699_v31, %v375_v1 }
 0x228   :  { %v390_v2 = vpop.permute.xlu2 %389 }
 0x229   :  { %v407_v51 = vsub.f32 %v747_v60, %v390_v2 }
 0x230   :  { %v411_v7 = vpop.permute.xlu2 %410  ;;  %v380_v31 = vpop.permute.xlu0 %379 }
 0x231   :  { %v428_v8 = vmul.f32 %v411_v7, %v392_v3  ;;  %v429_v9 = vmul.f32 %v411_v7, %v393_v4  ;;  %v430_v10 = vmul.f32 %v411_v7, %v394_v5  ;;  %v431_v11 = vmul.f32 %v411_v7, %v395_v6 }
 0x232   :  { %v396_v20 = vsub.f32 %v701_v32, %v380_v31  ;;  %v397_v21 = vsub.f32 %v703_v33, %v380_v31  ;;  %v398_v22 = vsub.f32 %v707_v35, %v380_v31  ;;  %v399_v23 = vsub.f32 %v709_v36, %v380_v31 }
 0x233   :  { %v468_v13 = vadd.f32 %v451_v12, %v428_v8  ;;  %v469_v14 = vadd.f32 %v451_v12, %v429_v9  ;;  %v470_v15 = vadd.f32 %v451_v12, %v430_v10  ;;  %v471_v16 = vadd.f32 %v451_v12, %v431_v11 }
 0x234   :  { %v404_v33 = vsub.f32 %v693_v28, %v390_v2  ;;  %v405_v35 = vsub.f32 %v695_v29, %v390_v2  ;;  %v406_v36 = vsub.f32 %v745_v59, %v390_v2 }
 0x235   :  { %v484_v17 = vmax.f32 %v468_v13, 0.0  ;;  %v485_v18 = vmax.f32 %v469_v14, 0.0  ;;  %v486_v19 = vmax.f32 %v470_v15, 0.0  ;;  %v487_v26 = vmax.f32 %v471_v16, 0.0 }
 0x237   :  { %500 = vst [vmem:[%s878_s5] sm:$0xff] %v484_v17 }
 0x238   :  { %501 = vst [vmem:[%s878_s5 + $0x8] sm:$0xff] %v485_v18  ;;  %v385_v27 = vpop.permute.xlu1 %384  ;;  %v466_v57 = vpop.permute.xlu0 %465 }
 0x239   :  { %502 = vst [vmem:[%s878_s5 + $0x10] sm:$0xff] %v486_v19  ;;  %v400_v0 = vsub.f32 %v685_v24, %v385_v27  ;;  %v401_v28 = vsub.f32 %v687_v25, %v385_v27  ;;  %v402_v29 = vsub.f32 %v719_v42, %v385_v27  ;;  %v403_v59 = vsub.f32 %v721_v43, %v385_v27 }
 0x23a   :  { %503 = vst [vmem:[%s878_s5 + $0x18] sm:$0xff] %v487_v26 }
 0x23c   :  { %v421_v30 = vpop.permute.xlu2 %420 }
 0x23d   :  { %v436_v4 = vmul.f32 %v421_v30, %v400_v0  ;;  %v437_v5 = vmul.f32 %v421_v30, %v401_v28  ;;  %v438_v6 = vmul.f32 %v421_v30, %v402_v29  ;;  %v439_v7 = vmul.f32 %v421_v30, %v403_v59 }
 0x244   :  { %v456_v41 = vpop.permute.xlu2 %455 }
 0x24c   :  { %v416_v34 = vpop.permute.xlu1 %415 }
 0x24d   :  { %v432_v37 = vmul.f32 %v416_v34, %v396_v20  ;;  %v433_v38 = vmul.f32 %v416_v34, %v397_v21  ;;  %v434_v39 = vmul.f32 %v416_v34, %v398_v22  ;;  %v435_v40 = vmul.f32 %v416_v34, %v399_v23 }
 0x24f   :  { %v472_v44 = vadd.f32 %v456_v41, %v432_v37  ;;  %v473_v45 = vadd.f32 %v456_v41, %v433_v38  ;;  %v474_v46 = vadd.f32 %v456_v41, %v434_v39  ;;  %v475_v47 = vadd.f32 %v456_v41, %v435_v40 }
 0x251   :  { %v488_v48 = vmax.f32 %v472_v44, 0.0  ;;  %v489_v49 = vmax.f32 %v473_v45, 0.0  ;;  %v490_v50 = vmax.f32 %v474_v46, 0.0  ;;  %v491_v32 = vmax.f32 %v475_v47, 0.0 }
 0x253   :  { %504 = vst [vmem:[%s878_s5 + $0x20] sm:$0xff] %v488_v48 }
 0x254   :  { %505 = vst [vmem:[%s878_s5 + $0x28] sm:$0xff] %v489_v49 }
 0x255   :  { %506 = vst [vmem:[%s878_s5 + $0x30] sm:$0xff] %v490_v50 }
 0x256   :  { %507 = vst [vmem:[%s878_s5 + $0x38] sm:$0xff] %v491_v32 }
 0x25c   :  { %v426_v52 = vpop.permute.xlu1 %425 }
 0x25d   :  { %v440_v53 = vmul.f32 %v426_v52, %v404_v33  ;;  %v441_v54 = vmul.f32 %v426_v52, %v405_v35  ;;  %v442_v55 = vmul.f32 %v426_v52, %v406_v36  ;;  %v443_v56 = vmul.f32 %v426_v52, %v407_v51 }
 0x25f   :  { %v480_v58 = vadd.f32 %v466_v57, %v440_v53  ;;  %v481_v61 = vadd.f32 %v466_v57, %v441_v54  ;;  %v482_v62 = vadd.f32 %v466_v57, %v442_v55  ;;  %v483_v63 = vadd.f32 %v466_v57, %v443_v56 }
 0x261   :  { %v496_v1 = vmax.f32 %v480_v58, 0.0  ;;  %v497_v60 = vmax.f32 %v481_v61, 0.0  ;;  %v498_v2 = vmax.f32 %v482_v62, 0.0  ;;  %v499_v3 = vmax.f32 %v483_v63, 0.0 }
 0x263   :  { %512 = vst [vmem:[%s878_s5 + $0x60] sm:$0xff] %v496_v1 }
 0x264   :  { %513 = vst [vmem:[%s878_s5 + $0x68] sm:$0xff] %v497_v60  ;;  %v461_v24 = vpop.permute.xlu1 %460 }
 0x265   :  { %514 = vst [vmem:[%s878_s5 + $0x70] sm:$0xff] %v498_v2  ;;  %v476_v25 = vadd.f32 %v461_v24, %v436_v4  ;;  %v477_v42 = vadd.f32 %v461_v24, %v437_v5  ;;  %v478_v43 = vadd.f32 %v461_v24, %v438_v6  ;;  %v479_v8 = vadd.f32 %v461_v24, %v439_v7 }
 0x266   :  { %515 = vst [vmem:[%s878_s5 + $0x78] sm:$0xff] %v499_v3 }
 0x267   :  { %v492_v9 = vmax.f32 %v476_v25, 0.0  ;;  %v493_v10 = vmax.f32 %v477_v42, 0.0  ;;  %v494_v11 = vmax.f32 %v478_v43, 0.0  ;;  %v495_v12 = vmax.f32 %v479_v8, 0.0 }
 0x269   :  { %508 = vst [vmem:[%s878_s5 + $0x40] sm:$0xff] %v492_v9 }
 0x26a   :  { %509 = vst [vmem:[%s878_s5 + $0x48] sm:$0xff] %v493_v10 }
 0x26b   :  { %510 = vst [vmem:[%s878_s5 + $0x50] sm:$0xff] %v494_v11 }
 0x26c   :  { %511 = vst [vmem:[%s878_s5 + $0x58] sm:$0xff] %v495_v12 }

</bundles_post_ra>
